<compile_context>
chip_gen: v7x
topology: tpu7x:2x2x1
jax: 0.10.0
libtpu: 0.0.40
codegen_flags: <defaults>
</compile_context>

<pallas_src>
import functools

import jax
import jax.numpy as jnp
from jax.experimental import pallas as pl


def _round_up(x, m):
    return (x + m - 1) // m * m


# ------------------------------ fused Pallas kernel ------------------------------ #

def _fused_gat_kernel(*refs, layer_cfgs, negative_slope, num_valid):
    """Full GAT_Model forward in one kernel invocation.

    refs = (x, adj, w_aug_0, bias_0, w_aug_1, bias_1, ..., out)
      x     [Np, F0]  f32      padded node features
      adj   [Np, Np]  int8     dense adjacency, adj[dst, src] = 1 (self loops included)
      w_aug [F_l, H*C + 2H] bf16  layer weight with att_src / att_dst folded in as extra
                               output columns ([HC:HC+H] -> a_src, [HC+H:HC+2H] -> a_dst)
      bias  [1, H*C or C] f32
      out   [Np, O_pad] f32    lane-dense padded output slab
    """
    x_ref, adj_ref = refs[0], refs[1]
    o_ref = refs[-1]
    Np = adj_ref.shape[0]

    # Additive softmax mask, built once from the int8 adjacency and reused by every
    # layer / head (int8 in HBM -> 4x fewer DMA bytes than f32 when scaled).
    adj_f = adj_ref[...].astype(jnp.float32)                             # [Np, Np]
    neg_bias = jnp.where(adj_f > 0.0, 0.0, -1e30)                        # [Np, Np]

    # Rows >= num_valid are padding; keep them zeroed so they never feed later layers.
    row_valid = jax.lax.broadcasted_iota(jnp.int32, (Np, 1), 0) < num_valid

    h = x_ref[...]                                                       # [Np, F0] f32

    for li, (H, C, concat) in enumerate(layer_cfgs):
        w_ref = refs[2 + 2 * li]
        b_ref = refs[3 + 2 * li]
        HC = H * C

        # Single bf16 MXU matmul produces the transformed features AND the per-head
        # attention logits (att_src / att_dst folded into extra weight columns).
        z = jnp.dot(h.astype(jnp.bfloat16), w_ref[...],
                    preferred_element_type=jnp.float32)                  # [Np, HC + 2H] f32
        xp_bf = z[:, :HC].astype(jnp.bfloat16)                           # [Np, HC]

        # Hoist the src-logit transpose out of the head loop: one XLU relayout per layer.
        src_logits_t = z[:, HC:HC + H].T                                 # [H, Np]

        head_outs = []
        for hh in range(H):
            a_src = src_logits_t[hh:hh + 1, :]                           # [1, Np]
            a_dst = z[:, HC + H + hh:HC + H + hh + 1]                    # [Np, 1]

            scores = a_dst + a_src                                       # [Np, Np] e[dst, src]
            scores = jnp.where(scores >= 0, scores, negative_slope * scores)
            scores = scores + neg_bias                                   # non-edges -> ~-1e30

            m = jnp.max(scores, axis=-1, keepdims=True)
            p = jnp.exp(scores - m)                                      # masked entries -> 0
            denom = jnp.sum(p, axis=-1, keepdims=True)
            alpha = p * pl.reciprocal(denom, approx=True)                # EUP slot, ~free

            # C-wide per-head aggregation matmul (no masked full-width product).
            xp_h = xp_bf[:, hh * C:(hh + 1) * C]                         # [Np, C]
            head_outs.append(jnp.dot(alpha.astype(jnp.bfloat16), xp_h,
                                     preferred_element_type=jnp.float32))

        if concat:
            acc = head_outs[0] if H == 1 else jnp.concatenate(head_outs, axis=-1)
        else:
            acc = head_outs[0]
            for t in head_outs[1:]:
                acc = acc + t
            acc = acc * (1.0 / H)

        h = acc + b_ref[...]                                             # [Np, out_w] f32
        h = jnp.where(row_valid, h, 0.0)                                 # keep padding clean

    # Single unmasked lane-dense full-slab store (pad built at trace time).
    pad = o_ref.shape[-1] - h.shape[-1]
    if pad:
        h = jnp.concatenate([h, jnp.zeros((Np, pad), jnp.float32)], axis=-1)
    o_ref[...] = h


# --------------------------------- model wrapper --------------------------------- #

def _fold_layer_weights(layer_params, input_dim):
    """Fold att_src / att_dst into W as extra output columns (one matmul per layer)."""
    folded, cfgs = [], []
    in_dim = input_dim
    for p in layer_params:
        H, _, C = p["att_src"].shape
        concat = bool(p["concat"])
        W = p["w"].astype(jnp.float32)                                   # [in_dim, H*C]
        Wh = W.reshape(in_dim, H, C)
        w_src = jnp.einsum("fhc,hc->fh", Wh, p["att_src"][:, 0, :])      # [in_dim, H]
        w_dst = jnp.einsum("fhc,hc->fh", Wh, p["att_dst"][:, 0, :])      # [in_dim, H]
        w_aug = jnp.concatenate([W, w_src, w_dst], axis=1)               # [in_dim, HC + 2H]
        w_aug = w_aug.astype(jnp.bfloat16)                               # bf16 MXU operand
        out_w = H * C if concat else C
        folded += [w_aug, p["bias"].reshape(1, out_w).astype(jnp.float32)]
        cfgs.append((H, C, concat))
        in_dim = out_w
    return folded, tuple(cfgs), in_dim


def gat_model_pallas(x, adj, layer_params, *, negative_slope=0.2):
    N, F0 = x.shape
    Np = _round_up(N, 8)                                       # sublane-aligned node count

    x_p = jnp.zeros((Np, F0), jnp.float32).at[:N, :].set(x.astype(jnp.float32))
    adj_p = jnp.zeros((Np, Np), jnp.int8).at[:N, :N].set((adj > 0).astype(jnp.int8))

    folded, cfgs, out_dim = _fold_layer_weights(layer_params, F0)
    inputs = [x_p, adj_p] + folded

    o_pad = _round_up(out_dim, 128)                            # lane-dense output slab

    kernel = functools.partial(_fused_gat_kernel, layer_cfgs=cfgs,
                               negative_slope=negative_slope, num_valid=N)

    in_specs = [pl.BlockSpec(a.shape, lambda: (0, 0)) for a in inputs]
    out_specs = pl.BlockSpec((Np, o_pad), lambda: (0, 0))

    out_p = pl.pallas_call(
        kernel,
        out_shape=jax.ShapeDtypeStruct((Np, o_pad), jnp.float32),
        in_specs=in_specs,
        out_specs=out_specs,
    )(*inputs)
    return out_p[:N, :out_dim]


def init_gat_model(key, input_dim, fc_dims, heads):
    layer_params = []
    for i, dim in enumerate(fc_dims):
        concat = i < len(fc_dims) - 1
        H, C = heads[i], dim
        key, kw, ks, kd = jax.random.split(key, 4)
        params = {
            "w": 0.1 * jax.random.normal(kw, (input_dim, H * C), jnp.float32),
            "att_src": 0.1 * jax.random.normal(ks, (H, 1, C), jnp.float32),
            "att_dst": 0.1 * jax.random.normal(kd, (H, 1, C), jnp.float32),
            "bias": jnp.zeros((H * C,) if concat else (C,), jnp.float32),
            "concat": concat,
        }
        layer_params.append(params)
        input_dim = dim * H
    return layer_params


# ------------------------------ pure-JAX reference ------------------------------ #

def gat_conv_ref(x, adj, p, concat):
    W, a_s, a_d, b = p["w"], p["att_src"], p["att_dst"], p["bias"]
    H, _, C = a_s.shape
    N = x.shape[0]
    xp = (x @ W).reshape(N, H, C)                          # [N, H, C]
    asrc = jnp.einsum("nhc,hc->nh", xp, a_s[:, 0, :])      # [N, H]
    adst = jnp.einsum("nhc,hc->nh", xp, a_d[:, 0, :])      # [N, H]
    e = adst[:, None, :] + asrc[None, :, :]                # [i, j, h]
    e = jnp.where(e >= 0, e, 0.2 * e)
    mask = (adj > 0)[:, :, None]
    e = jnp.where(mask, e, -1e30)
    e = e - jnp.max(e, axis=1, keepdims=True)
    pexp = jnp.where(mask, jnp.exp(e), 0.0)
    alpha = pexp / jnp.sum(pexp, axis=1, keepdims=True)    # softmax over sources j
    out = jnp.einsum("ijh,jhc->ihc", alpha, xp)            # [N, H, C]
    out = out.reshape(N, H * C) if concat else out.mean(axis=1)
    return out + b


def gat_model_ref(x, adj, layer_params):
    for p in layer_params:
        x = gat_conv_ref(x, adj, p, p["concat"])
    return x


# -------------------------------------- main -------------------------------------- #

if __name__ == "__main__":
    key = jax.random.PRNGKey(0)

    # Model config: GAT_Model(input_dim=8, fc_dims=[16, 8], heads=[2, 1])
    input_dim, fc_dims, heads = 8, [16, 8], [2, 1]

    N, E = 12, 32  # nodes, edges
    key, kx, ke = jax.random.split(key, 3)
    x = jax.random.normal(kx, (N, input_dim), jnp.float32)
    edge_index = jax.random.randint(ke, (2, E), 0, N)       # [2, E] (src, dst)

    # Dense adjacency with self loops (GATConv default add_self_loops=True).
    adj = jnp.zeros((N, N), jnp.float32)
    adj = adj.at[edge_index[1], edge_index[0]].set(1.0)     # adj[dst, src] = 1
    adj = adj.at[jnp.arange(N), jnp.arange(N)].set(1.0)

    layer_params = init_gat_model(key, input_dim, fc_dims, heads)

    out = gat_model_pallas(x, adj, layer_params)
    out = jax.block_until_ready(out)

    ref = gat_model_ref(x, adj, layer_params)
    assert out.shape == (N, fc_dims[-1]), out.shape
    max_err = float(jnp.max(jnp.abs(out - ref)))
    # Tolerance absorbs bf16 MXU operands + approx reciprocal (f32 accumulation throughout).
    assert jnp.allclose(out, ref, rtol=5e-3, atol=5e-3), max_err

    print("KERNEL_OK")
</pallas_src>

<mosaic_0001>
module attributes {stable_mosaic.version = 11 : i64} {
  func.func @_fused_gat_kernel(%arg0: memref<16x8xf32, #tpu.memory_space<vmem>>, %arg1: memref<16x16xi8, #tpu.memory_space<vmem>>, %arg2: memref<8x36xbf16, #tpu.memory_space<vmem>>, %arg3: memref<1x32xf32, #tpu.memory_space<vmem>>, %arg4: memref<32x10xbf16, #tpu.memory_space<vmem>>, %arg5: memref<1x8xf32, #tpu.memory_space<vmem>>, %arg6: memref<16x128xf32, #tpu.memory_space<vmem>>) attributes {dimension_semantics = [], scalar_prefetch = 0 : i64, scratch_operands = 0 : i64, tpu.core_type = #tpu.core_type<tc>} {
    %c0 = arith.constant 0 : index
    %c0_0 = arith.constant 0 : index
    %0 = vector.load %arg1[%c0, %c0_0] : memref<16x16xi8, #tpu.memory_space<vmem>>, vector<16x16xi8>
    %1 = arith.sitofp %0 : vector<16x16xi8> to vector<16x16xf32>
    %cst = arith.constant 0.000000e+00 : f32
    %2 = vector.broadcast %cst : f32 to vector<16x16xf32>
    %3 = arith.cmpf ogt, %1, %2 : vector<16x16xf32>
    %cst_1 = arith.constant 0.000000e+00 : f32
    %cst_2 = arith.constant -1.000000e+30 : f32
    %4 = vector.broadcast %cst_1 : f32 to vector<16x16xf32>
    %5 = vector.broadcast %cst_2 : f32 to vector<16x16xf32>
    %6 = arith.select %3, %4, %5 : vector<16x16xi1>, vector<16x16xf32>
    %7 = tpu.iota {dimensions = array<i32: 0>} : vector<16x1xi32>
    %c12_i32 = arith.constant 12 : i32
    %8 = vector.broadcast %c12_i32 : i32 to vector<16x1xi32>
    %9 = arith.cmpi slt, %7, %8 : vector<16x1xi32>
    %c0_3 = arith.constant 0 : index
    %c0_4 = arith.constant 0 : index
    %10 = vector.load %arg0[%c0_3, %c0_4] : memref<16x8xf32, #tpu.memory_space<vmem>>, vector<16x8xf32>
    %11 = arith.truncf %10 : vector<16x8xf32> to vector<16x8xbf16>
    %c0_5 = arith.constant 0 : index
    %c0_6 = arith.constant 0 : index
    %12 = vector.load %arg2[%c0_5, %c0_6] : memref<8x36xbf16, #tpu.memory_space<vmem>>, vector<8x36xbf16>
    %cst_7 = arith.constant dense<0.000000e+00> : vector<16x36xf32>
    %13 = tpu.matmul %11, %12, %cst_7 {dimension_numbers = #tpu.dot_dimension_numbers<[1], [0], [0], [1], [0, 0, 1, 1], [], []>} : vector<16x8xbf16>, vector<8x36xbf16>, vector<16x36xf32> -> vector<16x36xf32>
    %14 = vector.extract_strided_slice %13 {offsets = [0, 0], sizes = [16, 32], strides = [1, 1]} : vector<16x36xf32> to vector<16x32xf32>
    %15 = arith.truncf %14 : vector<16x32xf32> to vector<16x32xbf16>
    %16 = vector.extract_strided_slice %13 {offsets = [0, 32], sizes = [16, 2], strides = [1, 1]} : vector<16x36xf32> to vector<16x2xf32>
    %17 = tpu.transpose %16, [1, 0] : vector<16x2xf32> -> vector<2x16xf32>
    %18 = vector.extract_strided_slice %17 {offsets = [0, 0], sizes = [1, 16], strides = [1, 1]} : vector<2x16xf32> to vector<1x16xf32>
    %19 = vector.extract_strided_slice %13 {offsets = [0, 34], sizes = [16, 1], strides = [1, 1]} : vector<16x36xf32> to vector<16x1xf32>
    %20 = vector.broadcast %19 : vector<16x1xf32> to vector<16x16xf32>
    %21 = vector.broadcast %18 : vector<1x16xf32> to vector<16x16xf32>
    %22 = arith.addf %20, %21 : vector<16x16xf32>
    %cst_8 = arith.constant 0.000000e+00 : f32
    %23 = vector.broadcast %cst_8 : f32 to vector<16x16xf32>
    %24 = arith.cmpf oge, %22, %23 : vector<16x16xf32>
    %cst_9 = arith.constant 2.000000e-01 : f32
    %25 = vector.broadcast %cst_9 : f32 to vector<16x16xf32>
    %26 = arith.mulf %25, %22 : vector<16x16xf32>
    %27 = arith.select %24, %22, %26 : vector<16x16xi1>, vector<16x16xf32>
    %28 = arith.addf %27, %6 : vector<16x16xf32>
    %cst_10 = arith.constant dense<0xFF800000> : vector<16xf32>
    %29 = vector.multi_reduction <maximumf>, %28, %cst_10 [1] : vector<16x16xf32> to vector<16xf32>
    %30 = vector.shape_cast %29 : vector<16xf32> to vector<16x1xf32>
    %31 = vector.broadcast %30 : vector<16x1xf32> to vector<16x16xf32>
    %32 = arith.subf %28, %31 : vector<16x16xf32>
    %33 = math.exp %32 : vector<16x16xf32>
    %cst_11 = arith.constant dense<0.000000e+00> : vector<16xf32>
    %34 = vector.multi_reduction <add>, %33, %cst_11 [1] : vector<16x16xf32> to vector<16xf32>
    %35 = vector.shape_cast %34 : vector<16xf32> to vector<16x1xf32>
    %36 = tpu.reciprocal %35 {approx = true} : vector<16x1xf32> -> vector<16x1xf32>
    %37 = vector.broadcast %36 : vector<16x1xf32> to vector<16x16xf32>
    %38 = arith.mulf %33, %37 : vector<16x16xf32>
    %39 = vector.extract_strided_slice %15 {offsets = [0, 0], sizes = [16, 16], strides = [1, 1]} : vector<16x32xbf16> to vector<16x16xbf16>
    %40 = arith.truncf %38 : vector<16x16xf32> to vector<16x16xbf16>
    %cst_12 = arith.constant dense<0.000000e+00> : vector<16x16xf32>
    %41 = tpu.matmul %40, %39, %cst_12 {dimension_numbers = #tpu.dot_dimension_numbers<[1], [0], [0], [1], [0, 0, 1, 1], [], []>} : vector<16x16xbf16>, vector<16x16xbf16>, vector<16x16xf32> -> vector<16x16xf32>
    %42 = vector.extract_strided_slice %17 {offsets = [1, 0], sizes = [1, 16], strides = [1, 1]} : vector<2x16xf32> to vector<1x16xf32>
    %43 = vector.extract_strided_slice %13 {offsets = [0, 35], sizes = [16, 1], strides = [1, 1]} : vector<16x36xf32> to vector<16x1xf32>
    %44 = vector.broadcast %43 : vector<16x1xf32> to vector<16x16xf32>
    %45 = vector.broadcast %42 : vector<1x16xf32> to vector<16x16xf32>
    %46 = arith.addf %44, %45 : vector<16x16xf32>
    %cst_13 = arith.constant 0.000000e+00 : f32
    %47 = vector.broadcast %cst_13 : f32 to vector<16x16xf32>
    %48 = arith.cmpf oge, %46, %47 : vector<16x16xf32>
    %cst_14 = arith.constant 2.000000e-01 : f32
    %49 = vector.broadcast %cst_14 : f32 to vector<16x16xf32>
    %50 = arith.mulf %49, %46 : vector<16x16xf32>
    %51 = arith.select %48, %46, %50 : vector<16x16xi1>, vector<16x16xf32>
    %52 = arith.addf %51, %6 : vector<16x16xf32>
    %cst_15 = arith.constant dense<0xFF800000> : vector<16xf32>
    %53 = vector.multi_reduction <maximumf>, %52, %cst_15 [1] : vector<16x16xf32> to vector<16xf32>
    %54 = vector.shape_cast %53 : vector<16xf32> to vector<16x1xf32>
    %55 = vector.broadcast %54 : vector<16x1xf32> to vector<16x16xf32>
    %56 = arith.subf %52, %55 : vector<16x16xf32>
    %57 = math.exp %56 : vector<16x16xf32>
    %cst_16 = arith.constant dense<0.000000e+00> : vector<16xf32>
    %58 = vector.multi_reduction <add>, %57, %cst_16 [1] : vector<16x16xf32> to vector<16xf32>
    %59 = vector.shape_cast %58 : vector<16xf32> to vector<16x1xf32>
    %60 = tpu.reciprocal %59 {approx = true} : vector<16x1xf32> -> vector<16x1xf32>
    %61 = vector.broadcast %60 : vector<16x1xf32> to vector<16x16xf32>
    %62 = arith.mulf %57, %61 : vector<16x16xf32>
    %63 = vector.extract_strided_slice %15 {offsets = [0, 16], sizes = [16, 16], strides = [1, 1]} : vector<16x32xbf16> to vector<16x16xbf16>
    %64 = arith.truncf %62 : vector<16x16xf32> to vector<16x16xbf16>
    %cst_17 = arith.constant dense<0.000000e+00> : vector<16x16xf32>
    %65 = tpu.matmul %64, %63, %cst_17 {dimension_numbers = #tpu.dot_dimension_numbers<[1], [0], [0], [1], [0, 0, 1, 1], [], []>} : vector<16x16xbf16>, vector<16x16xbf16>, vector<16x16xf32> -> vector<16x16xf32>
    %66 = tpu.concatenate %41, %65 in 1 : vector<16x16xf32>, vector<16x16xf32> -> vector<16x32xf32>
    %c0_18 = arith.constant 0 : index
    %c0_19 = arith.constant 0 : index
    %67 = vector.load %arg3[%c0_18, %c0_19] : memref<1x32xf32, #tpu.memory_space<vmem>>, vector<1x32xf32>
    %68 = vector.broadcast %67 : vector<1x32xf32> to vector<16x32xf32>
    %69 = arith.addf %66, %68 : vector<16x32xf32>
    %cst_20 = arith.constant 0.000000e+00 : f32
    %70 = vector.shape_cast %9 : vector<16x1xi1> to vector<16x1xi1>
    %71 = vector.broadcast %70 : vector<16x1xi1> to vector<16x32xi1>
    %72 = vector.broadcast %cst_20 : f32 to vector<16x32xf32>
    %73 = arith.select %71, %69, %72 : vector<16x32xi1>, vector<16x32xf32>
    %74 = arith.truncf %73 : vector<16x32xf32> to vector<16x32xbf16>
    %c0_21 = arith.constant 0 : index
    %c0_22 = arith.constant 0 : index
    %75 = vector.load %arg4[%c0_21, %c0_22] : memref<32x10xbf16, #tpu.memory_space<vmem>>, vector<32x10xbf16>
    %cst_23 = arith.constant dense<0.000000e+00> : vector<16x10xf32>
    %76 = tpu.matmul %74, %75, %cst_23 {dimension_numbers = #tpu.dot_dimension_numbers<[1], [0], [0], [1], [0, 0, 1, 1], [], []>} : vector<16x32xbf16>, vector<32x10xbf16>, vector<16x10xf32> -> vector<16x10xf32>
    %77 = vector.extract_strided_slice %76 {offsets = [0, 0], sizes = [16, 8], strides = [1, 1]} : vector<16x10xf32> to vector<16x8xf32>
    %78 = arith.truncf %77 : vector<16x8xf32> to vector<16x8xbf16>
    %79 = vector.extract_strided_slice %76 {offsets = [0, 8], sizes = [16, 1], strides = [1, 1]} : vector<16x10xf32> to vector<16x1xf32>
    %80 = tpu.transpose %79, [1, 0] : vector<16x1xf32> -> vector<1x16xf32>
    %81 = vector.extract_strided_slice %76 {offsets = [0, 9], sizes = [16, 1], strides = [1, 1]} : vector<16x10xf32> to vector<16x1xf32>
    %82 = vector.broadcast %81 : vector<16x1xf32> to vector<16x16xf32>
    %83 = vector.broadcast %80 : vector<1x16xf32> to vector<16x16xf32>
    %84 = arith.addf %82, %83 : vector<16x16xf32>
    %cst_24 = arith.constant 0.000000e+00 : f32
    %85 = vector.broadcast %cst_24 : f32 to vector<16x16xf32>
    %86 = arith.cmpf oge, %84, %85 : vector<16x16xf32>
    %cst_25 = arith.constant 2.000000e-01 : f32
    %87 = vector.broadcast %cst_25 : f32 to vector<16x16xf32>
    %88 = arith.mulf %87, %84 : vector<16x16xf32>
    %89 = arith.select %86, %84, %88 : vector<16x16xi1>, vector<16x16xf32>
    %90 = arith.addf %89, %6 : vector<16x16xf32>
    %cst_26 = arith.constant dense<0xFF800000> : vector<16xf32>
    %91 = vector.multi_reduction <maximumf>, %90, %cst_26 [1] : vector<16x16xf32> to vector<16xf32>
    %92 = vector.shape_cast %91 : vector<16xf32> to vector<16x1xf32>
    %93 = vector.broadcast %92 : vector<16x1xf32> to vector<16x16xf32>
    %94 = arith.subf %90, %93 : vector<16x16xf32>
    %95 = math.exp %94 : vector<16x16xf32>
    %cst_27 = arith.constant dense<0.000000e+00> : vector<16xf32>
    %96 = vector.multi_reduction <add>, %95, %cst_27 [1] : vector<16x16xf32> to vector<16xf32>
    %97 = vector.shape_cast %96 : vector<16xf32> to vector<16x1xf32>
    %98 = tpu.reciprocal %97 {approx = true} : vector<16x1xf32> -> vector<16x1xf32>
    %99 = vector.broadcast %98 : vector<16x1xf32> to vector<16x16xf32>
    %100 = arith.mulf %95, %99 : vector<16x16xf32>
    %101 = arith.truncf %100 : vector<16x16xf32> to vector<16x16xbf16>
    %cst_28 = arith.constant dense<0.000000e+00> : vector<16x8xf32>
    %102 = tpu.matmul %101, %78, %cst_28 {dimension_numbers = #tpu.dot_dimension_numbers<[1], [0], [0], [1], [0, 0, 1, 1], [], []>} : vector<16x16xbf16>, vector<16x8xbf16>, vector<16x8xf32> -> vector<16x8xf32>
    %cst_29 = arith.constant 1.000000e+00 : f32
    %103 = vector.broadcast %cst_29 : f32 to vector<16x8xf32>
    %104 = arith.mulf %102, %103 : vector<16x8xf32>
    %c0_30 = arith.constant 0 : index
    %c0_31 = arith.constant 0 : index
    %105 = vector.load %arg5[%c0_30, %c0_31] : memref<1x8xf32, #tpu.memory_space<vmem>>, vector<1x8xf32>
    %106 = vector.broadcast %105 : vector<1x8xf32> to vector<16x8xf32>
    %107 = arith.addf %104, %106 : vector<16x8xf32>
    %cst_32 = arith.constant 0.000000e+00 : f32
    %108 = vector.shape_cast %9 : vector<16x1xi1> to vector<16x1xi1>
    %109 = vector.broadcast %108 : vector<16x1xi1> to vector<16x8xi1>
    %110 = vector.broadcast %cst_32 : f32 to vector<16x8xf32>
    %111 = arith.select %109, %107, %110 : vector<16x8xi1>, vector<16x8xf32>
    %cst_33 = arith.constant 0.000000e+00 : f32
    %112 = vector.broadcast %cst_33 : f32 to vector<16x120xf32>
    %113 = tpu.concatenate %111, %112 in 1 : vector<16x8xf32>, vector<16x120xf32> -> vector<16x128xf32>
    %c0_34 = arith.constant 0 : index
    %c0_35 = arith.constant 0 : index
    %114 = vector.load %arg6[%c0_34, %c0_35] : memref<16x128xf32, #tpu.memory_space<vmem>>, vector<16x128xf32>
    tpu.vector_store %arg6[%c0_34, %c0_35], %113 {strides = array<i32>} : memref<16x128xf32, #tpu.memory_space<vmem>>, vector<16x128xf32>,
    return
  }
}

</mosaic_0001>

<bundles_post_ra>
// kernel: tpu_custom_call.1
= control target key start
LH: loop header
LB: loop body
LE: loop exit
PB: predicated region body
PF: predicated region fallthrough
CT: control target
= control target key end

     0   :  { %vm48_vm0 = vcmask 1043456   ;;  %v686_v2 = vmov 0.0   ;;  %vm687_vm1 = vmmov 0   ;;  %vm44_vm2 = vcmask 64512   ;;  %s836_s0 = inlined_call_operand.vmem [shape: f32[16,8], index: 0, kind: input, shape index: {}]   ;;  %s837_s1 = inlined_call_operand.vmem [shape: s8[16,16], index: 1, kind: input, shape index: {}]   ;;  %s838_s2 = inlined_call_operand.vmem [shape: bf16[8,36], index: 2, kind: input, shape index: {}]   ;;  %s839_s3 = inlined_call_operand.vmem [shape: f32[1,32], index: 3, kind: input, shape index: {}]   ;;  %s840_s4 = inlined_call_operand.vmem [shape: bf16[32,10], index: 4, kind: input, shape index: {}]   ;;  %s841_s5 = inlined_call_operand.vmem [shape: f32[1,8], index: 5, kind: input, shape index: {}]   ;;  %s842_s6 = inlined_call_operand.hbm [shape: f32[16,128], index: 6, kind: output, shape index: {}]  }
   0x1   :  { %v43_v0 = vld [vmem:[%s838_s2] sm:$0xf]  ;;  %587 = vmatprep.subr.bf16.mxu0 %v686_v2  ;;  %589 = vmatprep.mubr.msk.bf16.mxu0 %vm687_vm1, %v686_v2  ;;  %v41_v4 = vld [vmem:[%s836_s0 + $0x8] sm:$0xff]  ;;  %v688_v6 = vmov 35  }
   0x2   :  { %v40_v1 = vld [vmem:[%s836_s0] sm:$0xff]  ;;  %v50_v3 = vsel %vm48_vm0, %v43_v0, 0  ;;  %632 = vset.pattern.permute.xlu1 %v688_v6  ;;  %593 = vmatprep.subr.bf16.mxu1 %v686_v2 }
   0x3   :  { %588 = vmatpush3.bf16.msra.mxu0 %v50_v3  ;;  %v42_v5 = vpack.c.bf16 %v41_v4, %v40_v1 }
   0x4   :  { %599 = vmatprep.subr.bf16.mxu0 %v686_v2 }
   0x5   :  { %11 = vsyncpa [#allocation3], 0  ;;  %595 = vmatprep.mubr.msk.bf16.mxu1 %vm687_vm1, %v686_v2  ;;  %s689_s0 = smov 96   ;;  %v690_v12 = vmov 34   ;;  %v35_v16 = vlaneseq  ;;  %v573_v18 = vld [vmem:[%s837_s1] sm:$0xf]  }
   0x6   :  { %590 = vmatmul.mubr.msk.bf16.vlgmr.msra.gmra.mrb[0].mxu0 %vm44_vm2, %v42_v5  ;;  %v575_v20 = vunpack.c.1.s8 %v573_v18  ;;  %v574_v21 = vunpack.c.0.s8 %v573_v18  ;;  %v691_v35 = vmov -1e+30   ;;  %vm156_vm8 = vcmask 130048   ;;  %s692_s1 = smov 112   ;;  %s694_s8 = smov 16  }
   0x7   :  { %601 = vmatprep.mubr.msk.bf16.mxu0 %vm687_vm1, %v686_v2  ;;  %v760_v19 = vshrl.u32 %v35_v16, 7  ;;  %vm359_vm11 = vcmask 261120   ;;  %s695_s10 = smov 120   ;;  %s696_s12 = smov [#allocation2]  }
   0x8   :  { %v30_v25 = vcvt.s32.f32 %v575_v20  ;;  %v29_v26 = vcvt.s32.f32 %v574_v21  ;;  %s552_s13 = sshll.u32 %s696_s12, 4  ;;  %s553_s13 = int_to_ptr.vmem [resolvable:$true] %s552_s13 }
   0x9   :  { %v144_v23 = vsub.s32 0, %v760_v19  ;;  %v234_v24 = vsub.s32 1, %v760_v19  ;;  %s662_s14 = scalar_lea.vmem %s553_s13, 256  ;;  %p667_p1 = scmp.lt.s32.totalorder %s553_s13, %s553_s13 }
   0xa   :  { %vm32_vm3 = vcmp.gt.f32.partialorder %v30_v25, 0.0  ;;  %vm31_vm4 = vcmp.gt.f32.partialorder %v29_v26, 0.0  ;;  %p663_p0 = scmp.ne.s32.totalorder %s553_s13, %s662_s14  ;;  %p668_p2 = scmp.lt.s32.totalorder %s662_s14, %s662_s14 }
   0xb   :  { %v766_v36 = vsel %vm32_vm3, 0.0, %v691_v35  ;;  %v768_v37 = vsel %vm31_vm4, 0.0, %v691_v35 }
   0xc   :  { %p669_p3 = por %p668_p2, %p667_p1 }
   0xe   :  { %p670_p4 = pnand %p669_p3, %p663_p0 }
  0xd9   :  { %v86_v7 = vpop.f32.mrb[0].mxu0 }
  0xda   :  { %225 = vperm.xlu1 %632, %v86_v7   ;;  %96 = vrot.lane.b32.xlu0 %v86_v7, %s689_s0  ;;  %v591_v8 = vpop.f32.mrb[1].mxu0 }
  0xdb   :  { %v89_v9 = vpop.f32.mrb[2].mxu0 }
  0xdc   :  { %v592_v10 = vpop.f32.mrb[3].mxu0  ;;  %v753_v11 = vpack.c.bf16 %v89_v9, %v86_v7 }
  0xde   :  { %229 = vperm.xlu1 %632, %v89_v9   ;;  %98 = vrot.lane.b32.xlu0 %v89_v9, %s689_s0 }
  0xdf   :  { %594 = vmatpush3.bf16.msra.mxu1 %v753_v11 }
  0xe0   :  { %605 = vmatprep.subr.bf16.mxu1 %v686_v2 }
  0xe2   :  { %633 = vset.pattern.permute.xlu1 %v690_v12 }
  0xe3   :  { %135 = vperm.xlu1 %633, %v86_v7  }
  0xe7   :  { %139 = vperm.xlu1 %633, %v89_v9  }
 0x14c   :  { %v97_v13 = vpop.permute.xlu0 %96 }
 0x14d   :  { %102 = vxpose.xlu0.b32.start [1/2] (short) (narrow) %v97_v13, 8 }
 0x150   :  { %v99_v14 = vpop.permute.xlu0 %98 }
 0x151   :  { %103 = vxpose.xlu0.b32.end [2/2] (short) (narrow) %v99_v14, 8 }
 0x159   :  { %v226_v15 = vpop.permute.xlu1 %225 }
 0x15d   :  { %v230_v17 = vpop.permute.xlu1 %229 }
 0x162   :  { %v136_v22 = vpop.permute.xlu1 %135 }
 0x166   :  { %v140_v30 = vpop.permute.xlu1 %139 }
 0x1cd   :  { %v118_v27 = vpop.trf.xlu0 }
 0x1ce   :  { %v145_v28 = vrot.slane %v118_v27, %v144_v23  ;;  %v235_v29 = vrot.slane %v118_v27, %v234_v24 }
 0x1d0   :  { %v146_v31 = vadd.f32 %v145_v28, %v136_v22  ;;  %v147_v32 = vadd.f32 %v145_v28, %v140_v30  ;;  %v236_v33 = vadd.f32 %v235_v29, %v226_v15  ;;  %v237_v34 = vadd.f32 %v235_v29, %v230_v17  ;;  %v636_v28 = vld [vmem:[%s840_s4] sm:$0xff]   ;;  %v637_v29 = vld [vmem:[%s840_s4 + $0x8] sm:$0xff]  }
 0x1d2   :  { %vm239_vm5 = vcmp.ge.f32.partialorder %v237_v34, 0.0  ;;  %v241_v38 = vmul.f32 0.2, %v237_v34  ;;  %vm238_vm6 = vcmp.ge.f32.partialorder %v236_v33, 0.0  ;;  %v240_v39 = vmul.f32 0.2, %v236_v33 }
 0x1d3   :  { %vm148_vm7 = vcmp.ge.f32.partialorder %v146_v31, 0.0  ;;  %v150_v40 = vmul.f32 0.2, %v146_v31  ;;  %v151_v43 = vmul.f32 0.2, %v147_v32  ;;  %vm149_vm9 = vcmp.ge.f32.partialorder %v147_v32, 0.0 }
 0x1d4   :  { %v243_v41 = vsel %vm239_vm5, %v237_v34, %v241_v38  ;;  %v242_v42 = vsel %vm238_vm6, %v236_v33, %v240_v39 }
 0x1d5   :  { %v245_v44 = vadd.f32 %v243_v41, %v766_v36  ;;  %v244_v45 = vadd.f32 %v242_v42, %v768_v37  ;;  %v152_v46 = vsel %vm148_vm7, %v146_v31, %v150_v40  ;;  %v153_v50 = vsel %vm149_vm9, %v147_v32, %v151_v43  ;;  %v566_v41 = vld [vmem:[%s839_s3] ss:$0 sm:$0xff] }
 0x1d6   :  { %v154_v49 = vadd.f32 %v152_v46, %v768_v37  ;;  %v155_v52 = vadd.f32 %v153_v50, %v766_v36  ;;  %v693_v31 = vmov 9  }
 0x1d7   :  { %v249_v47 = vsel %vm156_vm8, %v245_v44, -inf  ;;  %v246_v48 = vsel %vm156_vm8, %v244_v45, -inf  ;;  %634 = vset.pattern.permute.xlu1 %v693_v31  ;;  %635 = vset.pattern.permute.xlu0 %v693_v31 }
 0x1d8   :  { %250 = vmax.xlane.f32.xlu0 %v249_v47  ;;  %247 = vmax.xlane.f32.xlu1 %v246_v48  ;;  %v157_v51 = vsel %vm156_vm8, %v154_v49, -inf  ;;  %v160_v53 = vsel %vm156_vm8, %v155_v52, -inf }
 0x1dc   :  { %158 = vmax.xlane.f32.xlu1 %v157_v51 }
 0x1e0   :  { %161 = vmax.xlane.f32.xlu1 %v160_v53 }
 0x265   :  { %v251_v54 = vpop.xlane.xlu0 %250  ;;  %v248_v55 = vpop.xlane.xlu1 %247 }
 0x266   :  { %v253_v56 = vsub.f32 %v245_v44, %v251_v54  ;;  %v252_v57 = vsub.f32 %v244_v45, %v248_v55 }
 0x268   :  { %v254_v58 = vmul.f32 1.442695, %v252_v57  ;;  %v256_v59 = vmul.f32 1.442695, %v253_v56 }
 0x269   :  { %v159_v60 = vpop.xlane.xlu1 %158 }
 0x26a   :  { %638 = vpow2.f32 %v254_v58  ;;  %v163_v7 = vsub.f32 %v154_v49, %v159_v60 }
 0x26b   :  { %640 = vpow2.f32 %v256_v59 }
 0x26c   :  { %v165_v8 = vmul.f32 1.442695, %v163_v7 }
 0x26d   :  { %v162_v61 = vpop.xlane.xlu1 %161 }
 0x26e   :  { %v164_v62 = vsub.f32 %v155_v52, %v162_v61 }
 0x270   :  { %v167_v63 = vmul.f32 1.442695, %v164_v62 }
 0x272   :  { %642 = vpow2.f32 %v167_v63 }
 0x273   :  { %644 = vpow2.f32 %v165_v8 }
 0x274   :  { %v639_v0 = vpop.eup %638 }
 0x275   :  { %v258_v1 = vsel %vm156_vm8, %v639_v0, 0.0  ;;  %v641_v3 = vpop.eup %640 }
 0x276   :  { %259 = vadd.xlane.f32.xlu1 %v258_v1  ;;  %v261_v4 = vsel %vm156_vm8, %v641_v3, 0.0 }
 0x27a   :  { %262 = vadd.xlane.f32.xlu1 %v261_v4 }
 0x27c   :  { %v643_v5 = vpop.eup %642 }
 0x27d   :  { %v172_v6 = vsel %vm156_vm8, %v643_v5, 0.0  ;;  %v645_v9 = vpop.eup %644 }
 0x27e   :  { %173 = vadd.xlane.f32.xlu0 %v172_v6  ;;  %v169_v10 = vsel %vm156_vm8, %v645_v9, 0.0 }
 0x28b   :  { %270 = vrot.lane.b32.xlu1 %v753_v11, %s692_s1 }
 0x2af   :  { %170 = vadd.xlane.f32.xlu1 %v169_v10 }
 0x303   :  { %v260_v12 = vpop.xlane.xlu1 %259 }
 0x304   :  { %646 = vrcp.f32 %v260_v12 }
 0x307   :  { %v263_v13 = vpop.xlane.xlu1 %262 }
 0x308   :  { %648 = vrcp.f32 %v263_v13 }
 0x30b   :  { %v271_v14 = vpop.permute.xlu1 %270  ;;  %v174_v20 = vpop.xlane.xlu0 %173 }
 0x30c   :  { %600 = vmatpush3.bf16.msra.mxu0 %v271_v14  ;;  %650 = vrcp.f32 %v174_v20 }
 0x30d   :  { %613 = vmatprep.subr.bf16.mxu0 %v686_v2 }
 0x30e   :  { %v647_v15 = vpop.eup %646 }
 0x30f   :  { %v266_v17 = vmul.f32 %v647_v15, %v639_v0 }
 0x312   :  { %v649_v16 = vpop.eup %648 }
 0x313   :  { %v267_v18 = vmul.f32 %v649_v16, %v641_v3 }
 0x315   :  { %v268_v11 = vpack.c.bf16 %v267_v18, %v266_v17 }
 0x316   :  { %v651_v22 = vpop.eup %650 }
 0x317   :  { %602 = vmatmul.mubr.msk.bf16.vlgmr.msra.gmra.mrb[4].mxu0 %vm156_vm8, %v268_v11  ;;  %v178_v26 = vmul.f32 %v651_v22, %v643_v5  ;;  %v570_v22 = vld [vmem:[%s841_s5] ss:$0 sm:$0xff] }
 0x318   :  { %615 = vmatprep.mubr.msk.bf16.mxu0 %vm687_vm1, %v686_v2 }
 0x33c   :  { %v171_v21 = vpop.xlane.xlu1 %170 }
 0x33d   :  { %652 = vrcp.f32 %v171_v21 }
 0x347   :  { %v653_v24 = vpop.eup %652 }
 0x348   :  { %v177_v25 = vmul.f32 %v653_v24, %v645_v9 }
 0x34a   :  { %v179_v27 = vpack.c.bf16 %v178_v26, %v177_v25 }
 0x34c   :  { %596 = vmatmul.mubr.msk.bf16.vlgmr.msra.gmra.mrb[0].mxu1 %vm156_vm8, %v179_v27 }
 0x34d   :  { %609 = vmatprep.mubr.msk.bf16.mxu1 %vm687_vm1, %v686_v2  ;;  %606 = vmatpush3.bf16.msra.mxu1 %v636_v28 }
 0x34e   :  { %607 = vmatprep.subr.bf16.mxu1 %v686_v2  ;;  %v798_v2 = vadd.s32 8, %v760_v19 }
 0x350   :  { %vm39_vm10 = vcmp.lt.s32.totalorder %v798_v2, 12 }
 0x351   :  { %608 = vmatpush3.bf16.msra.mxu1 %v637_v29 }
 0x3ea   :  { %v310_v30 = vpop.f32.mrb[4].mxu0 }
 0x3eb   :  { %v603_v32 = vpop.f32.mrb[5].mxu0 }
 0x3ec   :  { %v313_v33 = vpop.f32.mrb[6].mxu0 }
 0x3ed   :  { %321 = vrot.lane.b32.xlu0 %v313_v33, %s694_s8  ;;  %v604_v34 = vpop.f32.mrb[7].mxu0 }
 0x3f1   :  { %319 = vrot.lane.b32.xlu0 %v310_v30, %s694_s8 }
 0x41f   :  { %v217_v35 = vpop.f32.mrb[0].mxu1 }
 0x420   :  { %v597_v38 = vpop.f32.mrb[1].mxu1 }
 0x421   :  { %v220_v39 = vpop.f32.mrb[2].mxu1 }
 0x422   :  { %v598_v40 = vpop.f32.mrb[3].mxu1 }
 0x45f   :  { %v322_v42 = vpop.permute.xlu0 %321 }
 0x460   :  { %v326_v43 = vsel %vm156_vm8, %v220_v39, %v322_v42 }
 0x461   :  { %v335_v44 = vadd.f32 %v566_v41, %v326_v43 }
 0x463   :  { %v320_v45 = vpop.permute.xlu0 %319  ;;  %v341_v48 = vsel %vm39_vm10, %v335_v44, 0.0 }
 0x464   :  { %v325_v46 = vsel %vm156_vm8, %v217_v35, %v320_v45 }
 0x465   :  { %v334_v47 = vadd.f32 %v566_v41, %v325_v46 }
 0x467   :  { %v342_v49 = vpack.c.bf16 %v341_v48, %v334_v47 }
 0x469   :  { %610 = vmatmul.mubr.msk.bf16.vlgmr.msra.gmra.mrb[4].mxu1 %vm359_vm11, %v342_v49 }
 0x53c   :  { %v397_v50 = vpop.f32.mrb[4].mxu1 }
 0x53d   :  { %446 = vperm.xlu1 %634, %v397_v50   ;;  %407 = vrot.lane.b32.xlu0 %v397_v50, %s695_s10  ;;  %v611_v51 = vpop.f32.mrb[5].mxu1 }
 0x53e   :  { %v400_v52 = vpop.f32.mrb[6].mxu1 }
 0x53f   :  { %v404_v53 = vpack.c.bf16 %v400_v52, %v397_v50  ;;  %v612_v54 = vpop.f32.mrb[7].mxu1 }
 0x541   :  { %409 = vrot.lane.b32.xlu0 %v400_v52, %s695_s10  ;;  %614 = vmatpush3.bf16.msra.mxu0 %v404_v53 }
 0x545   :  { %450 = vperm.xlu0 %635, %v400_v52  }
 0x5af   :  { %v408_v55 = vpop.permute.xlu0 %407 }
 0x5b0   :  { %413 = vxpose.xlu0.b32.start [1/2] (short) (narrow) %v408_v55, 8 }
 0x5b3   :  { %v410_v56 = vpop.permute.xlu0 %409 }
 0x5b4   :  { %414 = vxpose.xlu0.b32.end [2/2] (short) (narrow) %v410_v56, 8 }
 0x5bc   :  { %v447_v60 = vpop.permute.xlu1 %446 }
 0x5c4   :  { %v451_v57 = vpop.permute.xlu0 %450 }
 0x630   :  { %v429_v58 = vpop.trf.xlu0 }
 0x631   :  { %v456_v59 = vrot.slane %v429_v58, %v144_v23 }
 0x633   :  { %v457_v61 = vadd.f32 %v456_v59, %v447_v60  ;;  %v458_v62 = vadd.f32 %v456_v59, %v451_v57 }
 0x635   :  { %v461_v63 = vmul.f32 0.2, %v457_v61  ;;  %v462_v0 = vmul.f32 0.2, %v458_v62  ;;  %vm460_vm12 = vcmp.ge.f32.partialorder %v458_v62, 0.0  ;;  %vm459_vm13 = vcmp.ge.f32.partialorder %v457_v61, 0.0 }
 0x637   :  { %v464_v1 = vsel %vm460_vm12, %v458_v62, %v462_v0  ;;  %v463_v3 = vsel %vm459_vm13, %v457_v61, %v461_v63 }
 0x638   :  { %v466_v4 = vadd.f32 %v464_v1, %v766_v36  ;;  %v465_v5 = vadd.f32 %v463_v3, %v768_v37 }
 0x63a   :  { %v470_v6 = vsel %vm156_vm8, %v466_v4, -inf  ;;  %v467_v7 = vsel %vm156_vm8, %v465_v5, -inf }
 0x63b   :  { %471 = vmax.xlane.f32.xlu0 %v470_v6  ;;  %468 = vmax.xlane.f32.xlu1 %v467_v7 }
 0x6c8   :  { %v472_v19 = vpop.xlane.xlu0 %471  ;;  %v469_v23 = vpop.xlane.xlu1 %468 }
 0x6c9   :  { %v474_v8 = vsub.f32 %v466_v4, %v472_v19  ;;  %v473_v9 = vsub.f32 %v465_v5, %v469_v23 }
 0x6cb   :  { %v475_v10 = vmul.f32 1.442695, %v473_v9  ;;  %v477_v12 = vmul.f32 1.442695, %v474_v8 }
 0x6cd   :  { %654 = vpow2.f32 %v475_v10 }
 0x6ce   :  { %656 = vpow2.f32 %v477_v12 }
 0x6d7   :  { %v655_v13 = vpop.eup %654 }
 0x6d8   :  { %v479_v14 = vsel %vm156_vm8, %v655_v13, 0.0  ;;  %v657_v36 = vpop.eup %656 }
 0x6d9   :  { %480 = vadd.xlane.f32.xlu1 %v479_v14  ;;  %v482_v37 = vsel %vm156_vm8, %v657_v36, 0.0 }
 0x6dd   :  { %483 = vadd.xlane.f32.xlu1 %v482_v37 }
 0x766   :  { %v481_v15 = vpop.xlane.xlu1 %480 }
 0x767   :  { %658 = vrcp.f32 %v481_v15 }
 0x76a   :  { %v484_v16 = vpop.xlane.xlu1 %483 }
 0x76b   :  { %660 = vrcp.f32 %v484_v16 }
 0x771   :  { %v659_v17 = vpop.eup %658 }
 0x772   :  { %v487_v11 = vmul.f32 %v659_v17, %v655_v13 }
 0x775   :  { %v661_v18 = vpop.eup %660 }
 0x776   :  { %v488_v20 = vmul.f32 %v661_v18, %v657_v36 }
 0x778   :  { %v489_v21 = vpack.c.bf16 %v488_v20, %v487_v11 }
 0x77a   :  { %616 = vmatmul.mubr.msk.bf16.vlgmr.msra.gmra.mrb[8].mxu0 %vm156_vm8, %v489_v21 }
 0x84d   :  { %v534_v24 = vpop.f32.mrb[8].mxu0 }
 0x84e   :  { %v535_v25 = vadd.f32 %v570_v22, %v534_v24  ;;  %v617_v26 = vpop.f32.mrb[9].mxu0 }
 0x84f   :  { %v537_v27 = vpop.f32.mrb[10].mxu0 }
 0x850   :  { %v543_v28 = vsel %vm44_vm2, %v535_v25, 0.0  ;;  %v538_v29 = vadd.f32 %v570_v22, %v537_v27  ;;  %v618_v30 = vpop.f32.mrb[11].mxu0 }
 0x851   :  { %545 = vst [vmem:[#allocation2] sm:$0xff] %v543_v28 }
 0x852   :  { %v542_v31 = vsel %vm39_vm10, %v538_v29, 0.0 }
 0x853   :  { %v544_v32 = vsel %vm44_vm2, %v542_v31, 0.0 }
 0x854   :  { %546 = vst [vmem:[#allocation2 + $0x8] sm:$0xff] %v544_v32 }
 0x855   :  { %673 = shalt.err (!%p670_p4)
}
 0x856   :  { %s674_s16 = scalar_lea.hbm %s842_s6, 256 }
 0x857   :  { %p675_p5 = scmp.ne.s32.totalorder %s842_s6, %s674_s16  ;;  %p678_p6 = scmp.lt.u32.totalorder %s674_s16, %s842_s6 }
 0x859   :  { %p680_p7 = pnand %p678_p6, %p675_p5 }
 0x85b   :  { %683 = shalt.err (!%p680_p7)
}
 0x85c   :  { %s697_s21 = smov 128   ;;  %s698_s22 = smov 8  }
 0x85d   :  { %558 = dma.vmem_to_hbm [thread:$0]  %s553_s13, 256, %s842_s6, [#allocation3], %s697_s21, %s697_s21, %s698_s22  }
 0x85e   :  { %684 = dma.done.wait [#allocation3], 256  }
 0x85f   :  { %685 = vsyncadd [#allocation3], 4294967040 }
 0x860   :  { %562 = vsyncpa [#allocation3], 1 }

</bundles_post_ra>
